<compile_context>
chip_gen: v7x
topology: tpu7x:2x2x1
jax: 0.10.0
libtpu: 0.0.40
codegen_flags: <defaults>
</compile_context>

<pallas_src>
import functools

import jax
import jax.numpy as jnp
from jax.experimental import pallas as pl
from jax.experimental.pallas import tpu as pltpu


def _round_up(x: int, m: int) -> int:
    return (x + m - 1) // m * m


def _pick_tile(dim: int, cap: int, align: int) -> int:
    """Largest `align`-aligned divisor of `dim` (itself a multiple of `align`)
    that is <= cap.  Never exceeds max(cap, align)."""
    cap = max(align, min(dim, cap))
    for d in range(cap, align - 1, -1):
        if dim % d == 0 and d % align == 0:
            return d
    return align


def _linear_with_repeat_kernel(x_ref, w1t_ref, z_ref, o_ref):
    # x_ref  : (TB, TK, N1)      tile of per-position features
    # w1t_ref: (N1, OUT_pad)     pre-transposed weight slice (grid-invariant)
    # z_ref  : (TB, OUT_pad)     y @ w2.T + bias, precomputed per ray (f32)
    # o_ref  : (TB, TK, OUT_pad)
    tb, tk, n1 = x_ref.shape
    out_w = w1t_ref.shape[1]
    # Flatten (TB, TK) into one M dim: a single big 2-D matmul fills the MXU.
    # TK is sublane-aligned, so this merges contiguous sublane dims (free).
    x2 = x_ref[...].reshape(tb * tk, n1)
    acc = jnp.dot(x2, w1t_ref[...], preferred_element_type=jnp.float32)
    acc = acc.reshape(tb, tk, out_w) + z_ref[...][:, None, :]
    o_ref[...] = acc.astype(o_ref.dtype)


@functools.partial(jax.jit, static_argnames=("tb", "tk"))
def linear_with_repeat(x, y, weight, bias=None, *, tb=None, tk=None):
    """x: (..., K, N1), y: (..., N2), weight: (OUT, N1+N2), bias: (OUT,) or None."""
    *lead, K, N1 = x.shape
    N2 = y.shape[-1]
    OUT = weight.shape[0]
    assert weight.shape[1] == N1 + N2
    assert tuple(y.shape[:-1]) == tuple(lead)

    B = 1
    for d in lead:
        B *= d
    x3 = x.reshape(B, K, N1)
    y2 = y.reshape(B, N2)

    out_dtype = x.dtype
    x_item = jnp.dtype(x.dtype).itemsize
    # Sublane packing granularity: f32 -> 8, bf16 -> 16, int8/fp8 -> 32.
    sub = 8 * max(1, 4 // x_item)

    # Lane-dense output: pad OUT up to a multiple of 128 so writeback uses
    # full-lane unmasked stores; the padding is sliced off after the call.
    OUT_pad = _round_up(OUT, 128)

    # ---- Grid-invariant work, hoisted out of the kernel loop ---------------
    # (If weight is reused across many calls, hoist these transposes to
    #  parameter-setup time to avoid re-reading the weight every call.)
    w1t = weight[:, :N1].T                                       # (N1, OUT)
    w2t = weight[:, N1:].T                                       # (N2, OUT)
    z = jnp.dot(y2, w2t, preferred_element_type=jnp.float32)     # (B, OUT) f32
    if bias is not None:
        z = z + bias.astype(jnp.float32)[None, :]
    if OUT_pad != OUT:
        w1t = jnp.pad(w1t, ((0, 0), (0, OUT_pad - OUT)))
        z = jnp.pad(z, ((0, 0), (0, OUT_pad - OUT)))
    w_res = N1 * OUT_pad * jnp.dtype(w1t.dtype).itemsize

    # ---- Tile selection: HBM-traffic targeted (kernel is mem-bound) --------
    row_bytes = N1 * x_item + OUT_pad * x_item          # bytes per (b, k) row
    budget = (40 << 20) - w_res                         # v7x-safe working set
    target_step = max(1 << 20, min(6 << 20, budget // 2))
    target_rows = max(sub, target_step // row_bytes)

    if tk is None:
        K_pad = _round_up(K, sub)
        tk = _pick_tile(K_pad, target_rows, sub)
    else:
        tk = K if tk >= K else max(sub, _round_up(tk, sub))
    K_pad = _round_up(K, tk)

    if tb is None:
        cap_b = max(1, target_rows // tk)
        if cap_b >= B:
            tb = B                                   # full extent: layout-legal
        else:
            tb = _pick_tile(_round_up(B, 8), cap_b, 8)   # z block needs tb % 8 == 0
    else:
        tb = B if tb >= B else max(8, _round_up(tb, 8))
    B_pad = _round_up(B, tb)

    # v7x has 2 TensorCores per chip: keep a mid-sized problem from collapsing
    # to a single grid step (one idle core).  No-op on v5e/v6e and tiny inputs.
    if (B_pad // tb == 1 and K_pad // tk == 1 and tk > sub
            and tb * tk * row_bytes > (2 << 20)):
        tk = _pick_tile(K_pad, max(sub, tk // 2), sub)
        K_pad = _round_up(K, tk)

    # ---- Pad ragged B / K up to the chosen tiles (sliced off afterwards) ---
    if B_pad != B or K_pad != K:
        x3 = jnp.pad(x3, ((0, B_pad - B), (0, K_pad - K), (0, 0)))
    if B_pad != B:
        z = jnp.pad(z, ((0, B_pad - B), (0, 0)))

    grid = (B_pad // tb, K_pad // tk)

    # Scoped-VMEM: double-buffered x/out/z blocks, single-buffered weight,
    # an f32 accumulator-sized temporary, plus a few MiB headroom.  Capped at
    # 48 MiB (safe on v7x's 64 MiB/TC physical VMEM), floored at 32 MiB.
    x_blk = tb * tk * N1 * x_item
    o_blk = tb * tk * OUT_pad * x_item
    z_blk = tb * OUT_pad * 4
    acc_tmp = tb * tk * OUT_pad * 4
    need = 2 * (x_blk + o_blk + z_blk) + w_res + acc_tmp
    vmem_limit = int(min(max(need + (4 << 20), 32 << 20), 48 << 20))
    vmem_limit = int(max(vmem_limit, need + (2 << 20)))   # never below need

    # Resident grid-invariant weight: single buffer (no double-buffer waste).
    try:
        w_spec = pl.BlockSpec((N1, OUT_pad), lambda i, j: (0, 0),
                              pipeline_mode=pl.Buffered(1))
    except (TypeError, AttributeError):
        # Fallback for jax versions without pipeline_mode on BlockSpec.
        w_spec = pl.BlockSpec((N1, OUT_pad), lambda i, j: (0, 0))

    out_pad3 = pl.pallas_call(
        _linear_with_repeat_kernel,
        out_shape=jax.ShapeDtypeStruct((B_pad, K_pad, OUT_pad), out_dtype),
        grid=grid,
        in_specs=[
            # x tile over (B, K)
            pl.BlockSpec((tb, tk, N1), lambda i, j: (i, j, 0)),
            w_spec,
            # per-ray y-term; K is the inner grid axis so this only re-fetches
            # when the B tile changes
            pl.BlockSpec((tb, OUT_pad), lambda i, j: (i, 0)),
        ],
        out_specs=pl.BlockSpec((tb, tk, OUT_pad), lambda i, j: (i, j, 0)),
        compiler_params=pltpu.CompilerParams(
            dimension_semantics=("parallel", "parallel"),
            vmem_limit_bytes=vmem_limit,
        ),
        cost_estimate=pl.CostEstimate(
            flops=2 * B_pad * K_pad * N1 * OUT_pad,
            transcendentals=0,
            bytes_accessed=(B_pad * K_pad * N1 * x_item
                            + w_res
                            + B_pad * OUT_pad * 4
                            + B_pad * K_pad * OUT_pad * x_item),
        ),
    )(x3, w1t, z)

    out3 = out_pad3[:B, :K, :OUT]
    return out3.reshape(*lead, K, OUT)


if __name__ == "__main__":
    # Small shapes consistent with the module:
    #   B (rays) = 2, K (positions per ray) = 16, n1 = 32, n2 = 16, out = 64
    B, K, N1, N2, OUT = 2, 16, 32, 16, 64
    IN = N1 + N2

    key = jax.random.PRNGKey(0)
    kx, ky, kw, kb = jax.random.split(key, 4)

    x = jax.random.normal(kx, (B, K, N1), dtype=jnp.float32)
    y = jax.random.normal(ky, (B, N2), dtype=jnp.float32)

    # Deterministic parameter init (kaiming-uniform style bounds, like nn.Linear).
    bound_w = (1.0 / IN) ** 0.5
    weight = jax.random.uniform(kw, (OUT, IN), jnp.float32, -bound_w, bound_w)
    bias = jax.random.uniform(kb, (OUT,), jnp.float32, -bound_w, bound_w)

    out = jax.block_until_ready(linear_with_repeat(x, y, weight, bias))

    # Pure-JAX reference: cat([x, y broadcast over k]) @ W.T + b
    y_exp = jnp.broadcast_to(y[:, None, :], (B, K, N2))
    ref = jnp.concatenate([x, y_exp], axis=-1) @ weight.T + bias

    assert out.shape == (B, K, OUT)
    assert jnp.allclose(out, ref, atol=1e-5, rtol=1e-5), "mismatch vs reference"

    print("KERNEL_OK")
</pallas_src>

<mosaic_0001>
module attributes {stable_mosaic.version = 11 : i64} {
  func.func @_linear_with_repeat_kernel(%arg0: i32, %arg1: i32, %arg2: memref<2x16x32xf32, #tpu.memory_space<vmem>>, %arg3: memref<32x128xf32, #tpu.memory_space<vmem>>, %arg4: memref<2x128xf32, #tpu.memory_space<vmem>>, %arg5: memref<2x16x128xf32, #tpu.memory_space<vmem>>) attributes {dimension_semantics = [#tpu.dimension_semantics<parallel>, #tpu.dimension_semantics<parallel>], iteration_bounds = array<i64: 1, 1>, scalar_prefetch = 0 : i64, scratch_operands = 0 : i64, tpu.core_type = #tpu.core_type<tc>, window_params = [{transform_indices = @transform_0, window_bounds = array<i64: 2, 16, 32>}, {pipeline_mode = #tpu.pipeline_mode<synchronous>, transform_indices = @transform_1, window_bounds = array<i64: 32, 128>}, {transform_indices = @transform_2, window_bounds = array<i64: 2, 128>}, {transform_indices = @transform_3, window_bounds = array<i64: 2, 16, 128>}]} {
    %c0 = arith.constant 0 : index
    %c0_0 = arith.constant 0 : index
    %c0_1 = arith.constant 0 : index
    %0 = vector.load %arg2[%c0, %c0_0, %c0_1] : memref<2x16x32xf32, #tpu.memory_space<vmem>>, vector<2x16x32xf32>
    %1 = vector.shape_cast %0 : vector<2x16x32xf32> to vector<32x32xf32>
    %c0_2 = arith.constant 0 : index
    %c0_3 = arith.constant 0 : index
    %2 = vector.load %arg3[%c0_2, %c0_3] : memref<32x128xf32, #tpu.memory_space<vmem>>, vector<32x128xf32>
    %cst = arith.constant dense<0.000000e+00> : vector<32x128xf32>
    %3 = tpu.matmul %1, %2, %cst {dimension_numbers = #tpu.dot_dimension_numbers<[1], [0], [0], [1], [0, 0, 1, 1], [], []>} : vector<32x32xf32>, vector<32x128xf32>, vector<32x128xf32> -> vector<32x128xf32>
    %4 = vector.shape_cast %3 : vector<32x128xf32> to vector<2x16x128xf32>
    %c0_4 = arith.constant 0 : index
    %c0_5 = arith.constant 0 : index
    %5 = vector.load %arg4[%c0_4, %c0_5] : memref<2x128xf32, #tpu.memory_space<vmem>>, vector<2x128xf32>
    %6 = vector.shape_cast %5 : vector<2x128xf32> to vector<2x1x128xf32>
    %7 = vector.broadcast %6 : vector<2x1x128xf32> to vector<2x16x128xf32>
    %8 = arith.addf %4, %7 : vector<2x16x128xf32>
    %c0_6 = arith.constant 0 : index
    %c0_7 = arith.constant 0 : index
    %c0_8 = arith.constant 0 : index
    %9 = vector.load %arg5[%c0_6, %c0_7, %c0_8] : memref<2x16x128xf32, #tpu.memory_space<vmem>>, vector<2x16x128xf32>
    tpu.vector_store %arg5[%c0_6, %c0_7, %c0_8], %8 {strides = array<i32>} : memref<2x16x128xf32, #tpu.memory_space<vmem>>, vector<2x16x128xf32>,
    return
  }
  func.func @transform_0(%arg0: i32, %arg1: i32) -> (i32, i32, i32) {
    %c0_i32 = arith.constant 0 : i32
    %c0_i32_0 = arith.constant 0 : i32
    return %arg0, %arg1, %c0_i32 : i32, i32, i32
  }
  func.func @transform_1(%arg0: i32, %arg1: i32) -> (i32, i32) {
    %c0_i32 = arith.constant 0 : i32
    %c0_i32_0 = arith.constant 0 : i32
    %c0_i32_1 = arith.constant 0 : i32
    return %c0_i32, %c0_i32_0 : i32, i32
  }
  func.func @transform_2(%arg0: i32, %arg1: i32) -> (i32, i32) {
    %c0_i32 = arith.constant 0 : i32
    %c0_i32_0 = arith.constant 0 : i32
    return %arg0, %c0_i32 : i32, i32
  }
  func.func @transform_3(%arg0: i32, %arg1: i32) -> (i32, i32, i32) {
    %c0_i32 = arith.constant 0 : i32
    %c0_i32_0 = arith.constant 0 : i32
    return %arg0, %arg1, %c0_i32 : i32, i32, i32
  }
}

</mosaic_0001>

<bundles_post_ra>
// kernel: linear_with_repeat.1
= control target key start
LH: loop header
LB: loop body
LE: loop exit
PB: predicated region body
PF: predicated region fallthrough
CT: control target
= control target key end

     0   :  { %vm23_vm0 = vcmask 261120   ;;  %s313_s0 = inlined_call_operand.vmem [shape: f32[2,16,32], index: 0, kind: input, shape index: {}]   ;;  %s314_s1 = inlined_call_operand.vmem [shape: f32[32,128], index: 1, kind: input, shape index: {}]   ;;  %s315_s2 = inlined_call_operand.vmem [shape: f32[2,128], index: 2, kind: input, shape index: {}]   ;;  %s316_s3 = inlined_call_operand.hbm [shape: f32[2,16,128], index: 3, kind: output, shape index: {}]  }
   0x1   :  { %v19_v0 = vld [vmem:[%s314_s1] sm:$0xff]  ;;  %v20_v1 = vld [vmem:[%s314_s1 + $0x8] sm:$0xff]  ;;  %v21_v2 = vld [vmem:[%s314_s1 + $0x10] sm:$0xff] }
   0x2   :  { %v206_v3 = vpack.c.bf16 %v20_v1, %v19_v0  ;;  %v22_v4 = vld [vmem:[%s314_s1 + $0x18] sm:$0xff]  ;;  %v15_v5 = vld [vmem:[%s313_s0] sm:$0xff]  ;;  %v17_v6 = vld [vmem:[%s313_s0 + $0x10] sm:$0xff] }
   0x3   :  { %v210_v7 = vpack.c.bf16 %v22_v4, %v21_v2  ;;  %200 = vmatprep.mubr.msk.f32.mxu0 %vm23_vm0, %v15_v5  ;;  %203 = vmatprep.mubr.msk.f32.mxu1 %vm23_vm0, %v17_v6 }
   0x4   :  { %8 = vsyncpa [#allocation3], 0  ;;  %207 = vmatprep.subr.bf16.mxu0 %v206_v3  ;;  %214 = vmatprep.subr.bf16.mxu1 %v206_v3  ;;  %v16_v8 = vld [vmem:[%s313_s0 + $0x8] sm:$0xff]  ;;  %v18_v9 = vld [vmem:[%s313_s0 + $0x18] sm:$0xff]  ;;  %v246_v10 = vmov 1966171168   ;;  %v134_v12 = vlaneseq }
   0x5   :  { %209 = vmatpush3.bf16.msra.mxu0 %v206_v3  ;;  %216 = vmatpush3.bf16.msra.mxu1 %v206_v3  ;;  %v132_v11 = vunpack.c.l.s4 %v246_v10  ;;  %v183_v15 = vld.sshfl [vmem:[%s315_s2] sm:$0x11 pattern:$0x75316420]  ;;  %s247_s0 = smov [#allocation2]  }
   0x6   :  { %211 = vmatprep.subr.bf16.mxu0 %v210_v7  ;;  %215 = vmatprep.subr.bf16.mxu1 %v210_v7  ;;  %v135_v14 = vshrl.u32 %v134_v12, 7  ;;  %v130_v17 = vcombine.high %v183_v15, %v183_v15  ;;  %s168_s29 = sshll.u32 %s247_s0, 4  ;;  %s169_s29 = int_to_ptr.vmem [resolvable:$true] %s168_s29 }
   0x7   :  { %v133_v13 = vunpack.c.0.s8 %v132_v11  ;;  %s222_s2 = scalar_lea.vmem %s169_s29, 512  ;;  %p227_p1 = scmp.lt.s32.totalorder %s169_s29, %s169_s29 }
   0x8   :  { %v147_v19 = vsub.s32 0, %v135_v14  ;;  %p223_p0 = scmp.ne.s32.totalorder %s169_s29, %s222_s2  ;;  %p228_p2 = scmp.lt.s32.totalorder %s222_s2, %s222_s2 }
   0x9   :  { %213 = vmatpush3.bf16.msra.mxu0 %v210_v7  ;;  %217 = vmatpush3.bf16.msra.mxu1 %v210_v7  ;;  %v136_v16 = vsub.s32 %v133_v13, %v135_v14 }
   0xa   :  { %p229_p3 = por %p228_p2, %p227_p1 }
   0xb   :  { %v137_v18 = vrot.slane %v183_v15, %v136_v16  ;;  %v144_v20 = vrot.slane %v130_v17, %v136_v16 }
   0xc   :  { %201 = vmatmul.mubr.msk.f32.vlgmr.msra.gmra.mrb[0].mxu0 %vm23_vm0, %v16_v8  ;;  %204 = vmatmul.mubr.msk.f32.vlgmr.msra.gmra.mrb[0].mxu1 %vm23_vm0, %v18_v9  ;;  %p230_p4 = pnand %p229_p3, %p223_p0 }
   0xd   :  { %v148_v21 = vrot.slane %v137_v18, %v147_v19  ;;  %v152_v22 = vrot.slane %v144_v20, %v147_v19 }
  0xdf   :  { %v202_v23 = vpop.f32.mrb[0].mxu0  ;;  %v205_v24 = vpop.f32.mrb[0].mxu1 }
  0xe0   :  { %v156_v25 = vadd.f32 %v202_v23, %v148_v21  ;;  %v158_v26 = vadd.f32 %v205_v24, %v152_v22  ;;  %v102_v27 = vpop.f32.mrb[1].mxu0  ;;  %v112_v28 = vpop.f32.mrb[1].mxu1 }
  0xe1   :  { %v155_v29 = vadd.f32 %v148_v21, %v102_v27  ;;  %v157_v30 = vadd.f32 %v152_v22, %v112_v28 }
  0xe2   :  { %160 = vst [vmem:[#allocation2 + $0x8] sm:$0xff] %v156_v25  ;;  %162 = vst [vmem:[#allocation2 + $0x18] sm:$0xff] %v158_v26 }
  0xe3   :  { %159 = vst [vmem:[#allocation2] sm:$0xff] %v155_v29  ;;  %161 = vst [vmem:[#allocation2 + $0x10] sm:$0xff] %v157_v30 }
  0xe4   :  { %233 = shalt.err (!%p230_p4)
}
  0xe5   :  { %s234_s5 = scalar_lea.hbm %s316_s3, 512 }
  0xe6   :  { %p235_p5 = scmp.ne.s32.totalorder %s316_s3, %s234_s5  ;;  %p238_p6 = scmp.lt.u32.totalorder %s234_s5, %s316_s3 }
  0xe8   :  { %p240_p7 = pnand %p238_p6, %p235_p5 }
  0xea   :  { %243 = shalt.err (!%p240_p7)
}
  0xeb   :  { %s248_s10 = smov 128   ;;  %s249_s11 = smov 8  }
  0xec   :  { %174 = dma.vmem_to_hbm [thread:$0]  %s169_s29, 512, %s316_s3, [#allocation3], %s248_s10, %s248_s10, %s249_s11  }
  0xed   :  { %244 = dma.done.wait [#allocation3], 512  }
  0xee   :  { %245 = vsyncadd [#allocation3], 4294966784 }
  0xef   :  { %178 = vsyncpa [#allocation3], 1 }

</bundles_post_ra>
